<compile_context>
chip_gen: v6e
topology: v6e:2x2x1
jax: 0.10.0
libtpu: 0.0.40
codegen_flags: <defaults>
</compile_context>

<pallas_src>
import jax
import jax.numpy as jnp
from jax import lax
from jax.experimental import pallas as pl
from jax.experimental.pallas import tpu as pltpu


def lstm_kernel(x_ref, wih_ref, b_ref, whh_ref, wlin_ref, blin_ref, out_ref):
    # x_ref:    (L, 1)      f32  input sequence (time-major, batch=1)
    # wih_ref:  (1, 4*Hp)   f32  input weights, gate-stacked (i|f|g|o), zero-padded
    # b_ref:    (1, 4*Hp)   f32  bias_ih + bias_hh, gate-stacked, zero-padded
    # whh_ref:  (Hp, 4*Hp)  bf16 hidden weights, gate-stacked + transposed (h @ W)
    # wlin_ref: (1, Hp)     f32  final linear weight row, zero-padded
    # blin_ref: (1,)        f32  final linear bias (SMEM scalar)
    # out_ref:  (1, 1)      f32
    L = x_ref.shape[0]
    Hp = wlin_ref.shape[1]

    # Hoisted input projection: input_size == 1, so x @ W_ih + b is a pure lane-broadcast
    # VPU multiply-add, done once for all timesteps and kept live in vregs (L=8 -> 4 vregs).
    xw = x_ref[...] * wih_ref[...] + b_ref[...]          # (L, 4*Hp) f32

    # Peeled t=0: h0 == c0 == 0, so gates == xw[0]; no matmul, and f*c == 0 so the
    # forget-gate sigmoid is skipped entirely.
    g0 = xw[0:1, :]
    i0 = jax.nn.sigmoid(g0[:, 0 * Hp:1 * Hp])
    gg0 = jnp.tanh(g0[:, 2 * Hp:3 * Hp])
    o0 = jax.nn.sigmoid(g0[:, 3 * Hp:4 * Hp])
    c = i0 * gg0                                          # (1, Hp) f32
    h = o0 * jnp.tanh(c)                                  # (1, Hp) f32

    # Remaining steps, fully unrolled (L static and small): one fused bf16 MXU matmul
    # (1, Hp) @ (Hp, 4*Hp) per step, f32 accumulation, feeding the EUP activations.
    for t in range(1, L):
        gates = (jnp.dot(h.astype(jnp.bfloat16), whh_ref[...],
                         preferred_element_type=jnp.float32)
                 + xw[t:t + 1, :])                        # (1, 4*Hp) f32
        i = jax.nn.sigmoid(gates[:, 0 * Hp:1 * Hp])
        f = jax.nn.sigmoid(gates[:, 1 * Hp:2 * Hp])
        g = jnp.tanh(gates[:, 2 * Hp:3 * Hp])
        o = jax.nn.sigmoid(gates[:, 3 * Hp:4 * Hp])
        c = f * c + i * g
        h = o * jnp.tanh(c)

    # Final Linear on the last hidden state (== predictions[-1] in the PyTorch module):
    # VPU multiply + lane reduce; padded wlin lanes are zero so the reduce is exact.
    proj = jnp.sum(h * wlin_ref[...], axis=-1, keepdims=True)   # (1, 1)
    out_ref[...] = proj + blin_ref[0]


@jax.jit
def lstm_forward(input_seq, packed):
    """input_seq: (L,) f32 -> (1,) f32  (== predictions[-1])."""
    wih_row, b_row, whh_st, wlin_row, blin = packed
    L = input_seq.shape[0]
    x = input_seq.reshape(L, 1).astype(jnp.float32)

    vmem = pl.BlockSpec(memory_space=pltpu.MemorySpace.VMEM)
    smem = pl.BlockSpec(memory_space=pltpu.MemorySpace.SMEM)
    out = pl.pallas_call(
        lstm_kernel,
        out_shape=jax.ShapeDtypeStruct((1, 1), jnp.float32),
        in_specs=[vmem, vmem, vmem, vmem, vmem, smem],
        out_specs=vmem,
    )(x, wih_row, b_row, whh_st, wlin_row, blin)
    return out.reshape(1)


def init_params(key, input_size=1, hidden=100, output_size=1):
    """PyTorch-default init: U(-1/sqrt(H), 1/sqrt(H)), PyTorch weight layout (gate order i,f,g,o)."""
    bound = 1.0 / jnp.sqrt(jnp.float32(hidden))
    ks = jax.random.split(key, 6)
    w_ih = jax.random.uniform(ks[0], (4 * hidden, input_size), jnp.float32, -bound, bound)
    w_hh = jax.random.uniform(ks[1], (4 * hidden, hidden), jnp.float32, -bound, bound)
    b_ih = jax.random.uniform(ks[2], (4 * hidden,), jnp.float32, -bound, bound)
    b_hh = jax.random.uniform(ks[3], (4 * hidden,), jnp.float32, -bound, bound)
    w_lin = jax.random.uniform(ks[4], (output_size, hidden), jnp.float32, -bound, bound)
    b_lin = jax.random.uniform(ks[5], (output_size,), jnp.float32, -bound, bound)
    return w_ih, w_hh, b_ih, b_hh, w_lin, b_lin


def pack_params(raw, hidden=100, hp=128):
    """Repack PyTorch-layout weights into the padded, gate-stacked, transposed kernel layout.

    W_hh is cast to bfloat16 (MXU-native operand dtype); everything else stays f32.
    Zero padding is exact in bf16, so padded lanes stay numerically inert.
    """
    w_ih, w_hh, b_ih, b_hh, w_lin, b_lin = raw
    H, Hp, G = hidden, hp, 4 * hp
    b_sum = (b_ih + b_hh).astype(jnp.float32)

    wih_row = jnp.zeros((1, G), jnp.float32)
    b_row = jnp.zeros((1, G), jnp.float32)
    whh_st = jnp.zeros((Hp, G), jnp.float32)
    for k in range(4):  # gate order i, f, g, o (PyTorch row ordering)
        wih_row = wih_row.at[0, k * Hp:k * Hp + H].set(w_ih[k * H:(k + 1) * H, 0])
        b_row = b_row.at[0, k * Hp:k * Hp + H].set(b_sum[k * H:(k + 1) * H])
        whh_st = whh_st.at[:H, k * Hp:k * Hp + H].set(w_hh[k * H:(k + 1) * H, :].T)
    whh_st = whh_st.astype(jnp.bfloat16)

    wlin_row = jnp.zeros((1, Hp), jnp.float32).at[0, :H].set(w_lin[0, :])
    blin = b_lin.astype(jnp.float32).reshape(1)
    return wih_row, b_row, whh_st, wlin_row, blin


def reference_forward(input_seq, raw):
    """Pure-JAX f32 reference replicating torch.nn.LSTM + Linear semantics (gate order i,f,g,o)."""
    w_ih, w_hh, b_ih, b_hh, w_lin, b_lin = raw
    H = w_hh.shape[1]
    h = jnp.zeros((H,), jnp.float32)
    c = jnp.zeros((H,), jnp.float32)

    def step(carry, x_t):
        h, c = carry
        gates = w_ih @ jnp.array([x_t]) + w_hh @ h + b_ih + b_hh
        i, f, g, o = jnp.split(gates, 4)
        i, f, o = jax.nn.sigmoid(i), jax.nn.sigmoid(f), jax.nn.sigmoid(o)
        g = jnp.tanh(g)
        c = f * c + i * g
        h = o * jnp.tanh(c)
        return (h, c), None

    (h, c), _ = lax.scan(step, (h, c), input_seq.astype(jnp.float32))
    return w_lin @ h + b_lin  # shape (1,)


if __name__ == "__main__":
    key = jax.random.PRNGKey(0)
    k_param, k_data = jax.random.split(key)

    hidden = 100   # module default hidden_layer_size=100
    hp = 128       # padded hidden dim (lane-aligned)
    seq_len = 8

    raw = init_params(k_param, input_size=1, hidden=hidden, output_size=1)
    packed = pack_params(raw, hidden=hidden, hp=hp)
    input_seq = jax.random.normal(k_data, (seq_len,), jnp.float32)

    out = lstm_forward(input_seq, packed)
    out = jax.block_until_ready(out)

    ref = reference_forward(input_seq, raw)
    assert out.shape == (1,)
    # bf16 W_hh / h operands (f32 accumulation) vs. pure-f32 reference -> bf16-level tolerance.
    assert jnp.allclose(out, ref, atol=5e-3, rtol=5e-3), (out, ref)

    print("KERNEL_OK")
</pallas_src>

<mosaic_0001>
module attributes {stable_mosaic.version = 11 : i64} {
  func.func @lstm_kernel(%arg0: memref<8x1xf32, #tpu.memory_space<vmem>>, %arg1: memref<1x512xf32, #tpu.memory_space<vmem>>, %arg2: memref<1x512xf32, #tpu.memory_space<vmem>>, %arg3: memref<128x512xbf16, #tpu.memory_space<vmem>>, %arg4: memref<1x128xf32, #tpu.memory_space<vmem>>, %arg5: memref<1xf32, #tpu.memory_space<smem>>, %arg6: memref<1x1xf32, #tpu.memory_space<vmem>>) attributes {dimension_semantics = [], scalar_prefetch = 0 : i64, scratch_operands = 0 : i64, tpu.core_type = #tpu.core_type<tc>} {
    %c0 = arith.constant 0 : index
    %c0_0 = arith.constant 0 : index
    %0 = vector.load %arg0[%c0, %c0_0] : memref<8x1xf32, #tpu.memory_space<vmem>>, vector<8x1xf32>
    %c0_1 = arith.constant 0 : index
    %c0_2 = arith.constant 0 : index
    %1 = vector.load %arg1[%c0_1, %c0_2] : memref<1x512xf32, #tpu.memory_space<vmem>>, vector<1x512xf32>
    %2 = vector.broadcast %0 : vector<8x1xf32> to vector<8x512xf32>
    %3 = vector.broadcast %1 : vector<1x512xf32> to vector<8x512xf32>
    %4 = arith.mulf %2, %3 : vector<8x512xf32>
    %c0_3 = arith.constant 0 : index
    %c0_4 = arith.constant 0 : index
    %5 = vector.load %arg2[%c0_3, %c0_4] : memref<1x512xf32, #tpu.memory_space<vmem>>, vector<1x512xf32>
    %6 = vector.broadcast %5 : vector<1x512xf32> to vector<8x512xf32>
    %7 = arith.addf %4, %6 : vector<8x512xf32>
    %8 = vector.extract_strided_slice %7 {offsets = [0, 0], sizes = [1, 512], strides = [1, 1]} : vector<8x512xf32> to vector<1x512xf32>
    %9 = vector.extract_strided_slice %8 {offsets = [0, 0], sizes = [1, 128], strides = [1, 1]} : vector<1x512xf32> to vector<1x128xf32>
    %10 = arith.negf %9 : vector<1x128xf32>
    %11 = math.exp %10 : vector<1x128xf32>
    %cst = arith.constant 1.000000e+00 : f32
    %12 = vector.broadcast %cst : f32 to vector<1x128xf32>
    %13 = arith.addf %12, %11 : vector<1x128xf32>
    %14 = arith.divf %12, %13 : vector<1x128xf32>
    %15 = vector.extract_strided_slice %8 {offsets = [0, 256], sizes = [1, 128], strides = [1, 1]} : vector<1x512xf32> to vector<1x128xf32>
    %16 = math.tanh %15 : vector<1x128xf32>
    %17 = vector.extract_strided_slice %8 {offsets = [0, 384], sizes = [1, 128], strides = [1, 1]} : vector<1x512xf32> to vector<1x128xf32>
    %18 = arith.negf %17 : vector<1x128xf32>
    %19 = math.exp %18 : vector<1x128xf32>
    %cst_5 = arith.constant 1.000000e+00 : f32
    %20 = vector.broadcast %cst_5 : f32 to vector<1x128xf32>
    %21 = arith.addf %20, %19 : vector<1x128xf32>
    %22 = arith.divf %20, %21 : vector<1x128xf32>
    %23 = arith.mulf %14, %16 : vector<1x128xf32>
    %24 = math.tanh %23 : vector<1x128xf32>
    %25 = arith.mulf %22, %24 : vector<1x128xf32>
    %26 = arith.truncf %25 : vector<1x128xf32> to vector<1x128xbf16>
    %c0_6 = arith.constant 0 : index
    %c0_7 = arith.constant 0 : index
    %27 = vector.load %arg3[%c0_6, %c0_7] : memref<128x512xbf16, #tpu.memory_space<vmem>>, vector<128x512xbf16>
    %cst_8 = arith.constant dense<0.000000e+00> : vector<1x512xf32>
    %28 = tpu.matmul %26, %27, %cst_8 {dimension_numbers = #tpu.dot_dimension_numbers<[1], [0], [0], [1], [0, 0, 1, 1], [], []>} : vector<1x128xbf16>, vector<128x512xbf16>, vector<1x512xf32> -> vector<1x512xf32>
    %29 = vector.extract_strided_slice %7 {offsets = [1, 0], sizes = [1, 512], strides = [1, 1]} : vector<8x512xf32> to vector<1x512xf32>
    %30 = arith.addf %28, %29 : vector<1x512xf32>
    %31 = vector.extract_strided_slice %30 {offsets = [0, 0], sizes = [1, 128], strides = [1, 1]} : vector<1x512xf32> to vector<1x128xf32>
    %32 = arith.negf %31 : vector<1x128xf32>
    %33 = math.exp %32 : vector<1x128xf32>
    %cst_9 = arith.constant 1.000000e+00 : f32
    %34 = vector.broadcast %cst_9 : f32 to vector<1x128xf32>
    %35 = arith.addf %34, %33 : vector<1x128xf32>
    %36 = arith.divf %34, %35 : vector<1x128xf32>
    %37 = vector.extract_strided_slice %30 {offsets = [0, 128], sizes = [1, 128], strides = [1, 1]} : vector<1x512xf32> to vector<1x128xf32>
    %38 = arith.negf %37 : vector<1x128xf32>
    %39 = math.exp %38 : vector<1x128xf32>
    %cst_10 = arith.constant 1.000000e+00 : f32
    %40 = vector.broadcast %cst_10 : f32 to vector<1x128xf32>
    %41 = arith.addf %40, %39 : vector<1x128xf32>
    %42 = arith.divf %40, %41 : vector<1x128xf32>
    %43 = vector.extract_strided_slice %30 {offsets = [0, 256], sizes = [1, 128], strides = [1, 1]} : vector<1x512xf32> to vector<1x128xf32>
    %44 = math.tanh %43 : vector<1x128xf32>
    %45 = vector.extract_strided_slice %30 {offsets = [0, 384], sizes = [1, 128], strides = [1, 1]} : vector<1x512xf32> to vector<1x128xf32>
    %46 = arith.negf %45 : vector<1x128xf32>
    %47 = math.exp %46 : vector<1x128xf32>
    %cst_11 = arith.constant 1.000000e+00 : f32
    %48 = vector.broadcast %cst_11 : f32 to vector<1x128xf32>
    %49 = arith.addf %48, %47 : vector<1x128xf32>
    %50 = arith.divf %48, %49 : vector<1x128xf32>
    %51 = arith.mulf %42, %23 : vector<1x128xf32>
    %52 = arith.mulf %36, %44 : vector<1x128xf32>
    %53 = arith.addf %51, %52 : vector<1x128xf32>
    %54 = math.tanh %53 : vector<1x128xf32>
    %55 = arith.mulf %50, %54 : vector<1x128xf32>
    %56 = arith.truncf %55 : vector<1x128xf32> to vector<1x128xbf16>
    %c0_12 = arith.constant 0 : index
    %c0_13 = arith.constant 0 : index
    %57 = vector.load %arg3[%c0_12, %c0_13] : memref<128x512xbf16, #tpu.memory_space<vmem>>, vector<128x512xbf16>
    %cst_14 = arith.constant dense<0.000000e+00> : vector<1x512xf32>
    %58 = tpu.matmul %56, %57, %cst_14 {dimension_numbers = #tpu.dot_dimension_numbers<[1], [0], [0], [1], [0, 0, 1, 1], [], []>} : vector<1x128xbf16>, vector<128x512xbf16>, vector<1x512xf32> -> vector<1x512xf32>
    %59 = vector.extract_strided_slice %7 {offsets = [2, 0], sizes = [1, 512], strides = [1, 1]} : vector<8x512xf32> to vector<1x512xf32>
    %60 = arith.addf %58, %59 : vector<1x512xf32>
    %61 = vector.extract_strided_slice %60 {offsets = [0, 0], sizes = [1, 128], strides = [1, 1]} : vector<1x512xf32> to vector<1x128xf32>
    %62 = arith.negf %61 : vector<1x128xf32>
    %63 = math.exp %62 : vector<1x128xf32>
    %cst_15 = arith.constant 1.000000e+00 : f32
    %64 = vector.broadcast %cst_15 : f32 to vector<1x128xf32>
    %65 = arith.addf %64, %63 : vector<1x128xf32>
    %66 = arith.divf %64, %65 : vector<1x128xf32>
    %67 = vector.extract_strided_slice %60 {offsets = [0, 128], sizes = [1, 128], strides = [1, 1]} : vector<1x512xf32> to vector<1x128xf32>
    %68 = arith.negf %67 : vector<1x128xf32>
    %69 = math.exp %68 : vector<1x128xf32>
    %cst_16 = arith.constant 1.000000e+00 : f32
    %70 = vector.broadcast %cst_16 : f32 to vector<1x128xf32>
    %71 = arith.addf %70, %69 : vector<1x128xf32>
    %72 = arith.divf %70, %71 : vector<1x128xf32>
    %73 = vector.extract_strided_slice %60 {offsets = [0, 256], sizes = [1, 128], strides = [1, 1]} : vector<1x512xf32> to vector<1x128xf32>
    %74 = math.tanh %73 : vector<1x128xf32>
    %75 = vector.extract_strided_slice %60 {offsets = [0, 384], sizes = [1, 128], strides = [1, 1]} : vector<1x512xf32> to vector<1x128xf32>
    %76 = arith.negf %75 : vector<1x128xf32>
    %77 = math.exp %76 : vector<1x128xf32>
    %cst_17 = arith.constant 1.000000e+00 : f32
    %78 = vector.broadcast %cst_17 : f32 to vector<1x128xf32>
    %79 = arith.addf %78, %77 : vector<1x128xf32>
    %80 = arith.divf %78, %79 : vector<1x128xf32>
    %81 = arith.mulf %72, %53 : vector<1x128xf32>
    %82 = arith.mulf %66, %74 : vector<1x128xf32>
    %83 = arith.addf %81, %82 : vector<1x128xf32>
    %84 = math.tanh %83 : vector<1x128xf32>
    %85 = arith.mulf %80, %84 : vector<1x128xf32>
    %86 = arith.truncf %85 : vector<1x128xf32> to vector<1x128xbf16>
    %c0_18 = arith.constant 0 : index
    %c0_19 = arith.constant 0 : index
    %87 = vector.load %arg3[%c0_18, %c0_19] : memref<128x512xbf16, #tpu.memory_space<vmem>>, vector<128x512xbf16>
    %cst_20 = arith.constant dense<0.000000e+00> : vector<1x512xf32>
    %88 = tpu.matmul %86, %87, %cst_20 {dimension_numbers = #tpu.dot_dimension_numbers<[1], [0], [0], [1], [0, 0, 1, 1], [], []>} : vector<1x128xbf16>, vector<128x512xbf16>, vector<1x512xf32> -> vector<1x512xf32>
    %89 = vector.extract_strided_slice %7 {offsets = [3, 0], sizes = [1, 512], strides = [1, 1]} : vector<8x512xf32> to vector<1x512xf32>
    %90 = arith.addf %88, %89 : vector<1x512xf32>
    %91 = vector.extract_strided_slice %90 {offsets = [0, 0], sizes = [1, 128], strides = [1, 1]} : vector<1x512xf32> to vector<1x128xf32>
    %92 = arith.negf %91 : vector<1x128xf32>
    %93 = math.exp %92 : vector<1x128xf32>
    %cst_21 = arith.constant 1.000000e+00 : f32
    %94 = vector.broadcast %cst_21 : f32 to vector<1x128xf32>
    %95 = arith.addf %94, %93 : vector<1x128xf32>
    %96 = arith.divf %94, %95 : vector<1x128xf32>
    %97 = vector.extract_strided_slice %90 {offsets = [0, 128], sizes = [1, 128], strides = [1, 1]} : vector<1x512xf32> to vector<1x128xf32>
    %98 = arith.negf %97 : vector<1x128xf32>
    %99 = math.exp %98 : vector<1x128xf32>
    %cst_22 = arith.constant 1.000000e+00 : f32
    %100 = vector.broadcast %cst_22 : f32 to vector<1x128xf32>
    %101 = arith.addf %100, %99 : vector<1x128xf32>
    %102 = arith.divf %100, %101 : vector<1x128xf32>
    %103 = vector.extract_strided_slice %90 {offsets = [0, 256], sizes = [1, 128], strides = [1, 1]} : vector<1x512xf32> to vector<1x128xf32>
    %104 = math.tanh %103 : vector<1x128xf32>
    %105 = vector.extract_strided_slice %90 {offsets = [0, 384], sizes = [1, 128], strides = [1, 1]} : vector<1x512xf32> to vector<1x128xf32>
    %106 = arith.negf %105 : vector<1x128xf32>
    %107 = math.exp %106 : vector<1x128xf32>
    %cst_23 = arith.constant 1.000000e+00 : f32
    %108 = vector.broadcast %cst_23 : f32 to vector<1x128xf32>
    %109 = arith.addf %108, %107 : vector<1x128xf32>
    %110 = arith.divf %108, %109 : vector<1x128xf32>
    %111 = arith.mulf %102, %83 : vector<1x128xf32>
    %112 = arith.mulf %96, %104 : vector<1x128xf32>
    %113 = arith.addf %111, %112 : vector<1x128xf32>
    %114 = math.tanh %113 : vector<1x128xf32>
    %115 = arith.mulf %110, %114 : vector<1x128xf32>
    %116 = arith.truncf %115 : vector<1x128xf32> to vector<1x128xbf16>
    %c0_24 = arith.constant 0 : index
    %c0_25 = arith.constant 0 : index
    %117 = vector.load %arg3[%c0_24, %c0_25] : memref<128x512xbf16, #tpu.memory_space<vmem>>, vector<128x512xbf16>
    %cst_26 = arith.constant dense<0.000000e+00> : vector<1x512xf32>
    %118 = tpu.matmul %116, %117, %cst_26 {dimension_numbers = #tpu.dot_dimension_numbers<[1], [0], [0], [1], [0, 0, 1, 1], [], []>} : vector<1x128xbf16>, vector<128x512xbf16>, vector<1x512xf32> -> vector<1x512xf32>
    %119 = vector.extract_strided_slice %7 {offsets = [4, 0], sizes = [1, 512], strides = [1, 1]} : vector<8x512xf32> to vector<1x512xf32>
    %120 = arith.addf %118, %119 : vector<1x512xf32>
    %121 = vector.extract_strided_slice %120 {offsets = [0, 0], sizes = [1, 128], strides = [1, 1]} : vector<1x512xf32> to vector<1x128xf32>
    %122 = arith.negf %121 : vector<1x128xf32>
    %123 = math.exp %122 : vector<1x128xf32>
    %cst_27 = arith.constant 1.000000e+00 : f32
    %124 = vector.broadcast %cst_27 : f32 to vector<1x128xf32>
    %125 = arith.addf %124, %123 : vector<1x128xf32>
    %126 = arith.divf %124, %125 : vector<1x128xf32>
    %127 = vector.extract_strided_slice %120 {offsets = [0, 128], sizes = [1, 128], strides = [1, 1]} : vector<1x512xf32> to vector<1x128xf32>
    %128 = arith.negf %127 : vector<1x128xf32>
    %129 = math.exp %128 : vector<1x128xf32>
    %cst_28 = arith.constant 1.000000e+00 : f32
    %130 = vector.broadcast %cst_28 : f32 to vector<1x128xf32>
    %131 = arith.addf %130, %129 : vector<1x128xf32>
    %132 = arith.divf %130, %131 : vector<1x128xf32>
    %133 = vector.extract_strided_slice %120 {offsets = [0, 256], sizes = [1, 128], strides = [1, 1]} : vector<1x512xf32> to vector<1x128xf32>
    %134 = math.tanh %133 : vector<1x128xf32>
    %135 = vector.extract_strided_slice %120 {offsets = [0, 384], sizes = [1, 128], strides = [1, 1]} : vector<1x512xf32> to vector<1x128xf32>
    %136 = arith.negf %135 : vector<1x128xf32>
    %137 = math.exp %136 : vector<1x128xf32>
    %cst_29 = arith.constant 1.000000e+00 : f32
    %138 = vector.broadcast %cst_29 : f32 to vector<1x128xf32>
    %139 = arith.addf %138, %137 : vector<1x128xf32>
    %140 = arith.divf %138, %139 : vector<1x128xf32>
    %141 = arith.mulf %132, %113 : vector<1x128xf32>
    %142 = arith.mulf %126, %134 : vector<1x128xf32>
    %143 = arith.addf %141, %142 : vector<1x128xf32>
    %144 = math.tanh %143 : vector<1x128xf32>
    %145 = arith.mulf %140, %144 : vector<1x128xf32>
    %146 = arith.truncf %145 : vector<1x128xf32> to vector<1x128xbf16>
    %c0_30 = arith.constant 0 : index
    %c0_31 = arith.constant 0 : index
    %147 = vector.load %arg3[%c0_30, %c0_31] : memref<128x512xbf16, #tpu.memory_space<vmem>>, vector<128x512xbf16>
    %cst_32 = arith.constant dense<0.000000e+00> : vector<1x512xf32>
    %148 = tpu.matmul %146, %147, %cst_32 {dimension_numbers = #tpu.dot_dimension_numbers<[1], [0], [0], [1], [0, 0, 1, 1], [], []>} : vector<1x128xbf16>, vector<128x512xbf16>, vector<1x512xf32> -> vector<1x512xf32>
    %149 = vector.extract_strided_slice %7 {offsets = [5, 0], sizes = [1, 512], strides = [1, 1]} : vector<8x512xf32> to vector<1x512xf32>
    %150 = arith.addf %148, %149 : vector<1x512xf32>
    %151 = vector.extract_strided_slice %150 {offsets = [0, 0], sizes = [1, 128], strides = [1, 1]} : vector<1x512xf32> to vector<1x128xf32>
    %152 = arith.negf %151 : vector<1x128xf32>
    %153 = math.exp %152 : vector<1x128xf32>
    %cst_33 = arith.constant 1.000000e+00 : f32
    %154 = vector.broadcast %cst_33 : f32 to vector<1x128xf32>
    %155 = arith.addf %154, %153 : vector<1x128xf32>
    %156 = arith.divf %154, %155 : vector<1x128xf32>
    %157 = vector.extract_strided_slice %150 {offsets = [0, 128], sizes = [1, 128], strides = [1, 1]} : vector<1x512xf32> to vector<1x128xf32>
    %158 = arith.negf %157 : vector<1x128xf32>
    %159 = math.exp %158 : vector<1x128xf32>
    %cst_34 = arith.constant 1.000000e+00 : f32
    %160 = vector.broadcast %cst_34 : f32 to vector<1x128xf32>
    %161 = arith.addf %160, %159 : vector<1x128xf32>
    %162 = arith.divf %160, %161 : vector<1x128xf32>
    %163 = vector.extract_strided_slice %150 {offsets = [0, 256], sizes = [1, 128], strides = [1, 1]} : vector<1x512xf32> to vector<1x128xf32>
    %164 = math.tanh %163 : vector<1x128xf32>
    %165 = vector.extract_strided_slice %150 {offsets = [0, 384], sizes = [1, 128], strides = [1, 1]} : vector<1x512xf32> to vector<1x128xf32>
    %166 = arith.negf %165 : vector<1x128xf32>
    %167 = math.exp %166 : vector<1x128xf32>
    %cst_35 = arith.constant 1.000000e+00 : f32
    %168 = vector.broadcast %cst_35 : f32 to vector<1x128xf32>
    %169 = arith.addf %168, %167 : vector<1x128xf32>
    %170 = arith.divf %168, %169 : vector<1x128xf32>
    %171 = arith.mulf %162, %143 : vector<1x128xf32>
    %172 = arith.mulf %156, %164 : vector<1x128xf32>
    %173 = arith.addf %171, %172 : vector<1x128xf32>
    %174 = math.tanh %173 : vector<1x128xf32>
    %175 = arith.mulf %170, %174 : vector<1x128xf32>
    %176 = arith.truncf %175 : vector<1x128xf32> to vector<1x128xbf16>
    %c0_36 = arith.constant 0 : index
    %c0_37 = arith.constant 0 : index
    %177 = vector.load %arg3[%c0_36, %c0_37] : memref<128x512xbf16, #tpu.memory_space<vmem>>, vector<128x512xbf16>
    %cst_38 = arith.constant dense<0.000000e+00> : vector<1x512xf32>
    %178 = tpu.matmul %176, %177, %cst_38 {dimension_numbers = #tpu.dot_dimension_numbers<[1], [0], [0], [1], [0, 0, 1, 1], [], []>} : vector<1x128xbf16>, vector<128x512xbf16>, vector<1x512xf32> -> vector<1x512xf32>
    %179 = vector.extract_strided_slice %7 {offsets = [6, 0], sizes = [1, 512], strides = [1, 1]} : vector<8x512xf32> to vector<1x512xf32>
    %180 = arith.addf %178, %179 : vector<1x512xf32>
    %181 = vector.extract_strided_slice %180 {offsets = [0, 0], sizes = [1, 128], strides = [1, 1]} : vector<1x512xf32> to vector<1x128xf32>
    %182 = arith.negf %181 : vector<1x128xf32>
    %183 = math.exp %182 : vector<1x128xf32>
    %cst_39 = arith.constant 1.000000e+00 : f32
    %184 = vector.broadcast %cst_39 : f32 to vector<1x128xf32>
    %185 = arith.addf %184, %183 : vector<1x128xf32>
    %186 = arith.divf %184, %185 : vector<1x128xf32>
    %187 = vector.extract_strided_slice %180 {offsets = [0, 128], sizes = [1, 128], strides = [1, 1]} : vector<1x512xf32> to vector<1x128xf32>
    %188 = arith.negf %187 : vector<1x128xf32>
    %189 = math.exp %188 : vector<1x128xf32>
    %cst_40 = arith.constant 1.000000e+00 : f32
    %190 = vector.broadcast %cst_40 : f32 to vector<1x128xf32>
    %191 = arith.addf %190, %189 : vector<1x128xf32>
    %192 = arith.divf %190, %191 : vector<1x128xf32>
    %193 = vector.extract_strided_slice %180 {offsets = [0, 256], sizes = [1, 128], strides = [1, 1]} : vector<1x512xf32> to vector<1x128xf32>
    %194 = math.tanh %193 : vector<1x128xf32>
    %195 = vector.extract_strided_slice %180 {offsets = [0, 384], sizes = [1, 128], strides = [1, 1]} : vector<1x512xf32> to vector<1x128xf32>
    %196 = arith.negf %195 : vector<1x128xf32>
    %197 = math.exp %196 : vector<1x128xf32>
    %cst_41 = arith.constant 1.000000e+00 : f32
    %198 = vector.broadcast %cst_41 : f32 to vector<1x128xf32>
    %199 = arith.addf %198, %197 : vector<1x128xf32>
    %200 = arith.divf %198, %199 : vector<1x128xf32>
    %201 = arith.mulf %192, %173 : vector<1x128xf32>
    %202 = arith.mulf %186, %194 : vector<1x128xf32>
    %203 = arith.addf %201, %202 : vector<1x128xf32>
    %204 = math.tanh %203 : vector<1x128xf32>
    %205 = arith.mulf %200, %204 : vector<1x128xf32>
    %206 = arith.truncf %205 : vector<1x128xf32> to vector<1x128xbf16>
    %c0_42 = arith.constant 0 : index
    %c0_43 = arith.constant 0 : index
    %207 = vector.load %arg3[%c0_42, %c0_43] : memref<128x512xbf16, #tpu.memory_space<vmem>>, vector<128x512xbf16>
    %cst_44 = arith.constant dense<0.000000e+00> : vector<1x512xf32>
    %208 = tpu.matmul %206, %207, %cst_44 {dimension_numbers = #tpu.dot_dimension_numbers<[1], [0], [0], [1], [0, 0, 1, 1], [], []>} : vector<1x128xbf16>, vector<128x512xbf16>, vector<1x512xf32> -> vector<1x512xf32>
    %209 = vector.extract_strided_slice %7 {offsets = [7, 0], sizes = [1, 512], strides = [1, 1]} : vector<8x512xf32> to vector<1x512xf32>
    %210 = arith.addf %208, %209 : vector<1x512xf32>
    %211 = vector.extract_strided_slice %210 {offsets = [0, 0], sizes = [1, 128], strides = [1, 1]} : vector<1x512xf32> to vector<1x128xf32>
    %212 = arith.negf %211 : vector<1x128xf32>
    %213 = math.exp %212 : vector<1x128xf32>
    %cst_45 = arith.constant 1.000000e+00 : f32
    %214 = vector.broadcast %cst_45 : f32 to vector<1x128xf32>
    %215 = arith.addf %214, %213 : vector<1x128xf32>
    %216 = arith.divf %214, %215 : vector<1x128xf32>
    %217 = vector.extract_strided_slice %210 {offsets = [0, 128], sizes = [1, 128], strides = [1, 1]} : vector<1x512xf32> to vector<1x128xf32>
    %218 = arith.negf %217 : vector<1x128xf32>
    %219 = math.exp %218 : vector<1x128xf32>
    %cst_46 = arith.constant 1.000000e+00 : f32
    %220 = vector.broadcast %cst_46 : f32 to vector<1x128xf32>
    %221 = arith.addf %220, %219 : vector<1x128xf32>
    %222 = arith.divf %220, %221 : vector<1x128xf32>
    %223 = vector.extract_strided_slice %210 {offsets = [0, 256], sizes = [1, 128], strides = [1, 1]} : vector<1x512xf32> to vector<1x128xf32>
    %224 = math.tanh %223 : vector<1x128xf32>
    %225 = vector.extract_strided_slice %210 {offsets = [0, 384], sizes = [1, 128], strides = [1, 1]} : vector<1x512xf32> to vector<1x128xf32>
    %226 = arith.negf %225 : vector<1x128xf32>
    %227 = math.exp %226 : vector<1x128xf32>
    %cst_47 = arith.constant 1.000000e+00 : f32
    %228 = vector.broadcast %cst_47 : f32 to vector<1x128xf32>
    %229 = arith.addf %228, %227 : vector<1x128xf32>
    %230 = arith.divf %228, %229 : vector<1x128xf32>
    %231 = arith.mulf %222, %203 : vector<1x128xf32>
    %232 = arith.mulf %216, %224 : vector<1x128xf32>
    %233 = arith.addf %231, %232 : vector<1x128xf32>
    %234 = math.tanh %233 : vector<1x128xf32>
    %235 = arith.mulf %230, %234 : vector<1x128xf32>
    %c0_48 = arith.constant 0 : index
    %c0_49 = arith.constant 0 : index
    %236 = vector.load %arg4[%c0_48, %c0_49] : memref<1x128xf32, #tpu.memory_space<vmem>>, vector<1x128xf32>
    %237 = arith.mulf %235, %236 : vector<1x128xf32>
    %cst_50 = arith.constant dense<0.000000e+00> : vector<1xf32>
    %238 = vector.multi_reduction <add>, %237, %cst_50 [1] : vector<1x128xf32> to vector<1xf32>
    %239 = vector.shape_cast %238 : vector<1xf32> to vector<1x1xf32>
    %c0_51 = arith.constant 0 : index
    %240 = memref.load %arg5[%c0_51] : memref<1xf32, #tpu.memory_space<smem>>
    %241 = vector.broadcast %240 : f32 to vector<1x1xf32>
    %242 = arith.addf %239, %241 : vector<1x1xf32>
    %c0_52 = arith.constant 0 : index
    %c0_53 = arith.constant 0 : index
    %243 = vector.load %arg6[%c0_52, %c0_53] : memref<1x1xf32, #tpu.memory_space<vmem>>, vector<1x1xf32>
    tpu.vector_store %arg6[%c0_52, %c0_53], %242 {strides = array<i32>} : memref<1x1xf32, #tpu.memory_space<vmem>>, vector<1x1xf32>,
    return
  }
}

</mosaic_0001>

<bundles_post_ra>
// kernel: lstm_forward.1
= control target key start
LH: loop header
LB: loop body
LE: loop exit
PB: predicated region body
PF: predicated region fallthrough
CT: control target
= control target key end

     0   :  { %12 = vsyncpa [#allocation4], 0  ;;  %s1869_s0 = inlined_call_operand.vmem [shape: f32[8,1], index: 0, kind: input, shape index: {}]   ;;  %s1870_s1 = inlined_call_operand.vmem [shape: f32[1,512], index: 1, kind: input, shape index: {}]   ;;  %s1871_s2 = inlined_call_operand.vmem [shape: f32[1,512], index: 2, kind: input, shape index: {}]   ;;  %s1872_s3 = inlined_call_operand.hbm [shape: bf16[128,512], index: 3, kind: input, shape index: {}]   ;;  %s1873_s4 = inlined_call_operand.vmem [shape: f32[1,128], index: 4, kind: input, shape index: {}]   ;;  %s1874_s5 = inlined_call_operand.<no memory space> [shape: f32[1], index: 5, kind: input, shape index: {}]   ;;  %s1875_s6 = inlined_call_operand.hbm [shape: f32[1,1], index: 6, kind: output, shape index: {}]  }
   0x1   :  { %13 = vsyncpa [#allocation5], 0  ;;  %s1428_s21 = smov [#allocation3]  }
   0x2   :  { %s25_s22 = sshll.u32 %s1428_s21, 4  ;;  %s26_s22 = int_to_ptr.vmem [resolvable:$true] %s25_s22 }
   0x3   :  { %s1392_s23 = scalar_lea.vmem %s26_s22, 4096  ;;  %p1397_p1 = scmp.lt.s32.totalorder %s26_s22, %s26_s22 }
   0x4   :  { %p1393_p0 = scmp.ne.s32.totalorder %s26_s22, %s1392_s23  ;;  %p1398_p2 = scmp.lt.s32.totalorder %s1392_s23, %s1392_s23 }
   0x6   :  { %p1399_p3 = por %p1398_p2, %p1397_p1 }
   0x8   :  { %p1400_p4 = pnand %p1399_p3, %p1393_p0 }
   0xa   :  { %1403 = shalt.err (!%p1400_p4)
}
   0xb   :  { %s1429_s24 = smov 256   ;;  %s1430_s25 = smov 16  }
   0xc   :  { %31 = dma.hbm_to_vmem [thread:$0]  %s1872_s3, 4096, %s26_s22, [#allocation4], %s1429_s24, %s1429_s24, %s1430_s25  }
   0xd   :  { %1424 = dma.done.wait [#allocation4], 4096  }
   0xe   :  { %1425 = vsyncadd [#allocation4], 4294963200  ;;  %v48_v0 = vlaneseq  ;;  %v1431_v1 = vmov 0   ;;  %v40_v4 = vld [vmem:[%s1869_s0] sm:$0xff]  ;;  %v1498_v10 = vld [vmem:[#allocation3 + $0xec] ss:$16 sps:$4 sm:$0xff]  }
   0xf   :  { %1201 = vset.pattern.permute.xlu0 %v1431_v1  ;;  %351 = vmatprep.mubr.bf16.mxu0 %v1431_v1  ;;  %v1483_v5 = vld [vmem:[%s1870_s1] sm:$0xf]  ;;  %v1493_v8 = vld [vmem:[#allocation3 + $0xe4] ss:$16 sps:$4 sm:$0xff]   ;;  %v1503_v12 = vld [vmem:[#allocation3 + $0xe8] ss:$16 sps:$4 sm:$0xff]  }
  0x10   :  { %v1473_v2 = vshrl.u32 %v48_v0, 7  ;;  %392 = vmatprep.mubr.bf16.mxu1 %v1431_v1  ;;  %v1488_v6 = vld [vmem:[%s1871_s2] sm:$0xf]  ;;  %44 = vperm.xlu0 %1201, %v40_v4   ;;  %v1506_v13 = vld [vmem:[#allocation3 + $0xc4] ss:$16 sps:$4 sm:$0xff]   ;;  %vm1117_vm0 = vcmask 1040384  }
  0x11   :  { %319 = vmatprep.subr.bf16.mxu0 %v1493_v8  ;;  %v1501_v11 = vld [vmem:[#allocation3 + $0xe0] ss:$16 sps:$4 sm:$0xff]   ;;  %360 = vmatprep.subr.bf16.mxu1 %v1498_v10  ;;  %v1510_v14 = vld [vmem:[#allocation3 + $0xcc] ss:$16 sps:$4 sm:$0xff]   ;;  %v1515_v16 = vld [vmem:[#allocation3 + $0xc8] ss:$16 sps:$4 sm:$0xff]  }
  0x12   :  { %v54_v3 = vsub.s32 1, %v1473_v2  ;;  %320 = vmatpush1.bf16.msra.mxu0 %v1501_v11  ;;  %361 = vmatpush1.bf16.msra.mxu1 %v1503_v12  ;;  %v1512_v15 = vld [vmem:[#allocation3 + $0xc0] ss:$16 sps:$4 sm:$0xff]   ;;  %v1518_v17 = vld [vmem:[#allocation3 + $0xa4] ss:$16 sps:$4 sm:$0xff]   ;;  %v50_v41 = vsub.s32 0, %v1473_v2 }
  0x13   :  { %321 = vmatprep.subr.bf16.mxu0 %v1506_v13  ;;  %362 = vmatprep.subr.bf16.mxu1 %v1510_v14  ;;  %v1520_v18 = vld [vmem:[#allocation3 + $0xac] ss:$16 sps:$4 sm:$0xff]   ;;  %v1522_v19 = vld [vmem:[#allocation3 + $0xa0] ss:$16 sps:$4 sm:$0xff]   ;;  %v1524_v20 = vld [vmem:[#allocation3 + $0xa8] ss:$16 sps:$4 sm:$0xff]  }
  0x14   :  { %v1491_v7 = vrot.slane %v1483_v5, %v54_v3  ;;  %v1496_v9 = vrot.slane %v1488_v6, %v54_v3  ;;  %v1528_v21 = vld [vmem:[#allocation3 + $0x84] ss:$16 sps:$4 sm:$0xff]   ;;  %v1532_v22 = vld [vmem:[#allocation3 + $0x8c] ss:$16 sps:$4 sm:$0xff]   ;;  %v1534_v23 = vld [vmem:[#allocation3 + $0x80] ss:$16 sps:$4 sm:$0xff]   ;;  %v51_v42 = vrot.slane %v1483_v5, %v50_v41  ;;  %v77_v44 = vrot.slane %v1488_v6, %v50_v41 }
  0x15   :  { %v1538_v24 = vld [vmem:[#allocation3 + $0x88] ss:$16 sps:$4 sm:$0xff]   ;;  %v1540_v25 = vld [vmem:[#allocation3 + $0x64] ss:$16 sps:$4 sm:$0xff]   ;;  %v1544_v26 = vld [vmem:[#allocation3 + $0x6c] ss:$16 sps:$4 sm:$0xff]  }
  0x16   :  { %322 = vmatpush1.bf16.msra.mxu0 %v1512_v15  ;;  %363 = vmatpush1.bf16.msra.mxu1 %v1515_v16  ;;  %v1546_v27 = vld [vmem:[#allocation3 + $0x60] ss:$16 sps:$4 sm:$0xff]   ;;  %v1548_v28 = vld [vmem:[#allocation3 + $0x68] ss:$16 sps:$4 sm:$0xff]   ;;  %v1552_v29 = vld [vmem:[#allocation3 + $0x44] ss:$16 sps:$4 sm:$0xff]  }
  0x17   :  { %323 = vmatprep.subr.bf16.mxu0 %v1518_v17  ;;  %364 = vmatprep.subr.bf16.mxu1 %v1520_v18  ;;  %v1556_v30 = vld [vmem:[#allocation3 + $0x4c] ss:$16 sps:$4 sm:$0xff]   ;;  %v1560_v31 = vld [vmem:[#allocation3 + $0x40] ss:$16 sps:$4 sm:$0xff]   ;;  %v1562_v32 = vld [vmem:[#allocation3 + $0x48] ss:$16 sps:$4 sm:$0xff]  }
  0x18   :  { %v1566_v33 = vld [vmem:[#allocation3 + $0x24] ss:$16 sps:$4 sm:$0xff]   ;;  %v1568_v34 = vld [vmem:[#allocation3 + $0x2c] ss:$16 sps:$4 sm:$0xff]   ;;  %v1572_v35 = vld [vmem:[#allocation3 + $0x20] ss:$16 sps:$4 sm:$0xff]  }
  0x19   :  { %v1574_v36 = vld [vmem:[#allocation3 + $0x28] ss:$16 sps:$4 sm:$0xff]   ;;  %v1578_v37 = vld [vmem:[#allocation3 + $0x4] ss:$16 sps:$4 sm:$0xff]   ;;  %v1580_v38 = vld [vmem:[#allocation3 + $0xc] ss:$16 sps:$4 sm:$0xff]  }
  0x1a   :  { %324 = vmatpush1.bf16.msra.mxu0 %v1522_v19  ;;  %365 = vmatpush1.bf16.msra.mxu1 %v1524_v20  ;;  %v1584_v39 = vld [vmem:[#allocation3] ss:$16 sps:$4 sm:$0xff]   ;;  %v1586_v40 = vld [vmem:[#allocation3 + $0x8] ss:$16 sps:$4 sm:$0xff]   ;;  %v62_v43 = vsub.s32 3, %v1473_v2  ;;  %v58_v52 = vsub.s32 2, %v1473_v2 }
  0x1b   :  { %325 = vmatprep.subr.bf16.mxu0 %v1528_v21  ;;  %366 = vmatprep.subr.bf16.mxu1 %v1532_v22  ;;  %s1432_s10 = smov [#allocation6]   ;;  %vm1124_vm1 = vcmask 0  }
  0x1c   :  { %v63_v48 = vrot.slane %v1483_v5, %v62_v43  ;;  %v89_v53 = vrot.slane %v1488_v6, %v62_v43  ;;  %v59_v55 = vrot.slane %v1483_v5, %v58_v52  ;;  %v85_v57 = vrot.slane %v1488_v6, %v58_v52  ;;  %s1132_s11 = sshll.u32 %s1432_s10, 4  ;;  %s1133_s11 = int_to_ptr.vmem [resolvable:$true] %s1132_s11 }
  0x1d   :  { %s1404_s12 = scalar_lea.vmem %s1133_s11, 16  ;;  %s1408_s13 = scalar_lea.vmem %s1133_s11, 32 }
  0x1e   :  { %326 = vmatpush1.bf16.msra.mxu0 %v1534_v23  ;;  %367 = vmatpush1.bf16.msra.mxu1 %v1538_v24  ;;  %p1405_p5 = scmp.ne.s32.totalorder %s1133_s11, %s1404_s12  ;;  %p1409_p6 = scmp.lt.s32.totalorder %s1133_s11, %s1133_s11 }
  0x1f   :  { %327 = vmatprep.subr.bf16.mxu0 %v1540_v25  ;;  %368 = vmatprep.subr.bf16.mxu1 %v1544_v26  ;;  %p1410_p7 = scmp.lt.s32.totalorder %s1408_s13, %s1404_s12 }
  0x21   :  { %p1411_p8 = por %p1410_p7, %p1409_p6 }
  0x22   :  { %328 = vmatpush1.bf16.msra.mxu0 %v1546_v27  ;;  %369 = vmatpush1.bf16.msra.mxu1 %v1548_v28 }
  0x23   :  { %329 = vmatprep.subr.bf16.mxu0 %v1552_v29  ;;  %370 = vmatprep.subr.bf16.mxu1 %v1556_v30  ;;  %p1412_p9 = pnand %p1411_p8, %p1405_p5 }
  0x26   :  { %330 = vmatpush1.bf16.msra.mxu0 %v1560_v31  ;;  %371 = vmatpush1.bf16.msra.mxu1 %v1562_v32 }
  0x27   :  { %331 = vmatprep.subr.bf16.mxu0 %v1566_v33  ;;  %372 = vmatprep.subr.bf16.mxu1 %v1568_v34 }
  0x2a   :  { %332 = vmatpush1.bf16.msra.mxu0 %v1572_v35  ;;  %373 = vmatpush1.bf16.msra.mxu1 %v1574_v36 }
  0x2b   :  { %333 = vmatprep.subr.bf16.mxu0 %v1578_v37  ;;  %374 = vmatprep.subr.bf16.mxu1 %v1580_v38 }
  0x2e   :  { %334 = vmatpush1.bf16.msra.mxu0 %v1584_v39  ;;  %375 = vmatpush1.bf16.msra.mxu1 %v1586_v40 }
  0x2f   :  { %434 = vmatprep.subr.bf16.mxu0 %v1493_v8  ;;  %475 = vmatprep.subr.bf16.mxu1 %v1498_v10 }
  0x8b   :  { %v45_v45 = vpop.permute.xlu0 %44 }
  0x8c   :  { %v68_v46 = vmul.f32 %v51_v42, %v45_v45  ;;  %v69_v47 = vmul.f32 %v1491_v7, %v45_v45  ;;  %v71_v54 = vmul.f32 %v63_v48, %v45_v45  ;;  %v70_v58 = vmul.f32 %v59_v55, %v45_v45 }
  0x8e   :  { %v1600_v49 = vadd.f32 %v77_v44, %v68_v46  ;;  %v1603_v50 = vadd.f32 %v1496_v9, %v69_v47  ;;  %v1609_v56 = vadd.f32 %v89_v53, %v71_v54  ;;  %v1613_v60 = vadd.f32 %v85_v57, %v70_v58 }
  0x90   :  { %v1141_v51 = vmul.f32 -1.442695, %v1600_v49  ;;  %v1142_v59 = vmul.f32 -1.442695, %v1609_v56  ;;  %v311_v41 = vrot.slane %v1600_v49, 1  ;;  %v312_v45 = vrot.slane %v1603_v50, 1 }
  0x91   :  { %v314_v58 = vrot.slane %v1609_v56, 1 }
  0x92   :  { %1250 = vpow2.f32 %v1141_v51 }
  0x93   :  { %1252 = vpow2.f32 %v1142_v59 }
  0x94   :  { %1254 = vtanh.f32 %v1613_v60 }
  0x9f   :  { %v1251_v61 = vpop.eup %1250 }
  0xa0   :  { %v101_v62 = vadd.f32 1.0, %v1251_v61  ;;  %v1253_v63 = vpop.eup %1252  ;;  %v313_v61 = vrot.slane %v1613_v60, 1 }
  0xa1   :  { %v108_v0 = vadd.f32 1.0, %v1253_v63  ;;  %v1255_v2 = vpop.eup %1254 }
  0xa2   :  { %1256 = vrcp.f32 %v101_v62 }
  0xa3   :  { %1258 = vrcp.f32 %v108_v0 }
  0xaf   :  { %v1257_v3 = vpop.eup %1256 }
  0xb0   :  { %v1616_v4 = vmul.f32 %v1257_v3, %v1255_v2  ;;  %v1259_v5 = vpop.eup %1258 }
  0xb2   :  { %1260 = vtanh.f32 %v1616_v4 }
  0xbf   :  { %v1261_v6 = vpop.eup %1260 }
  0xc0   :  { %v113_v7 = vmul.f32 %v1261_v6, %v1259_v5 }
  0xc2   :  { %v114_v9 = vpack.c.bf16 %v113_v7, %v113_v7 }
  0xc4   :  { %352 = vmatmul.mubr.bf16.vlgmr.msra.gmra.mxu0 %v114_v9  ;;  %393 = vmatmul.mubr.bf16.vlgmr.msra.gmra.mxu1 %v114_v9 }
  0xc5   :  { %435 = vmatpush1.bf16.msra.mxu0 %v1501_v11  ;;  %476 = vmatpush1.bf16.msra.mxu1 %v1503_v12 }
  0xc6   :  { %436 = vmatprep.subr.bf16.mxu0 %v1506_v13  ;;  %477 = vmatprep.subr.bf16.mxu1 %v1510_v14 }
  0xc7   :  { %466 = vmatprep.mubr.bf16.mxu0 %v1431_v1  ;;  %507 = vmatprep.mubr.bf16.mxu1 %v1431_v1 }
  0xc9   :  { %437 = vmatpush1.bf16.msra.mxu0 %v1512_v15  ;;  %478 = vmatpush1.bf16.msra.mxu1 %v1515_v16 }
  0xca   :  { %438 = vmatprep.subr.bf16.mxu0 %v1518_v17  ;;  %479 = vmatprep.subr.bf16.mxu1 %v1520_v18 }
  0xcd   :  { %439 = vmatpush1.bf16.msra.mxu0 %v1522_v19  ;;  %480 = vmatpush1.bf16.msra.mxu1 %v1524_v20 }
  0xce   :  { %440 = vmatprep.subr.bf16.mxu0 %v1528_v21  ;;  %481 = vmatprep.subr.bf16.mxu1 %v1532_v22 }
  0xd1   :  { %441 = vmatpush1.bf16.msra.mxu0 %v1534_v23  ;;  %482 = vmatpush1.bf16.msra.mxu1 %v1538_v24 }
  0xd2   :  { %442 = vmatprep.subr.bf16.mxu0 %v1540_v25  ;;  %483 = vmatprep.subr.bf16.mxu1 %v1544_v26 }
  0xd5   :  { %443 = vmatpush1.bf16.msra.mxu0 %v1546_v27  ;;  %484 = vmatpush1.bf16.msra.mxu1 %v1548_v28 }
  0xd6   :  { %444 = vmatprep.subr.bf16.mxu0 %v1552_v29  ;;  %485 = vmatprep.subr.bf16.mxu1 %v1556_v30 }
  0xd9   :  { %445 = vmatpush1.bf16.msra.mxu0 %v1560_v31  ;;  %486 = vmatpush1.bf16.msra.mxu1 %v1562_v32 }
  0xda   :  { %446 = vmatprep.subr.bf16.mxu0 %v1566_v33  ;;  %487 = vmatprep.subr.bf16.mxu1 %v1568_v34 }
  0xdd   :  { %447 = vmatpush1.bf16.msra.mxu0 %v1572_v35  ;;  %488 = vmatpush1.bf16.msra.mxu1 %v1574_v36 }
  0xde   :  { %448 = vmatprep.subr.bf16.mxu0 %v1578_v37  ;;  %489 = vmatprep.subr.bf16.mxu1 %v1580_v38 }
  0xe1   :  { %449 = vmatpush1.bf16.msra.mxu0 %v1584_v39  ;;  %490 = vmatpush1.bf16.msra.mxu1 %v1586_v40 }
  0xe2   :  { %549 = vmatprep.subr.bf16.mxu0 %v1493_v8  ;;  %590 = vmatprep.subr.bf16.mxu1 %v1498_v10 }
 0x184   :  { %v353_v42 = vpop.f32.mrf.mxu0  ;;  %v394_v43 = vpop.f32.mrf.mxu1 }
 0x185   :  { %v354_v44 = vadd.f32 %v353_v42, %v311_v41  ;;  %v395_v62 = vadd.f32 %v394_v43, %v313_v61 }
 0x186   :  { %v355_v46 = vpop.f32.mrf.mxu0  ;;  %v396_v47 = vpop.f32.mrf.mxu1 }
 0x187   :  { %v1175_v48 = vmul.f32 -1.442695, %v354_v44  ;;  %v356_v51 = vadd.f32 %v355_v46, %v312_v45  ;;  %v397_v59 = vadd.f32 %v396_v47, %v314_v58 }
 0x188   :  { %v357_v52 = vpop.f32.mrf.mxu0  ;;  %v398_v53 = vpop.f32.mrf.mxu1 }
 0x189   :  { %1262 = vpow2.f32 %v1175_v48  ;;  %v1176_v54 = vmul.f32 -1.442695, %v356_v51  ;;  %v1177_v63 = vmul.f32 -1.442695, %v397_v59 }
 0x18a   :  { %v358_v55 = vpop.f32.mrf.mxu0  ;;  %v399_v57 = vpop.f32.mrf.mxu1 }
 0x18b   :  { %1264 = vpow2.f32 %v1176_v54  ;;  %v427_v55 = vrot.slane %v1603_v50, 2 }
 0x18c   :  { %1266 = vtanh.f32 %v395_v62 }
 0x18d   :  { %1268 = vpow2.f32 %v1177_v63 }
 0x196   :  { %v1263_v0 = vpop.eup %1262 }
 0x197   :  { %v404_v2 = vadd.f32 1.0, %v1263_v0 }
 0x198   :  { %v1265_v3 = vpop.eup %1264 }
 0x199   :  { %1270 = vrcp.f32 %v404_v2  ;;  %v410_v5 = vadd.f32 1.0, %v1265_v3  ;;  %v1267_v6 = vpop.eup %1266 }
 0x19a   :  { %v1269_v7 = vpop.eup %1268 }
 0x19b   :  { %1272 = vrcp.f32 %v410_v5  ;;  %v417_v44 = vadd.f32 1.0, %v1269_v7  ;;  %v429_v5 = vrot.slane %v1609_v56, 2  ;;  %v428_v7 = vrot.slane %v1613_v60, 2 }
 0x19d   :  { %1274 = vrcp.f32 %v417_v44 }
 0x1a6   :  { %v1271_v9 = vpop.eup %1270 }
 0x1a7   :  { %v421_v41 = vmul.f32 %v1271_v9, %v1267_v6 }
 0x1a8   :  { %v1273_v42 = vpop.eup %1272 }
 0x1a9   :  { %v420_v45 = vmul.f32 %v1273_v42, %v1616_v4  ;;  %v426_v4 = vrot.slane %v1600_v49, 2 }
 0x1aa   :  { %v1275_v43 = vpop.eup %1274 }
 0x1ab   :  { %v1658_v46 = vadd.f32 %v421_v41, %v420_v45 }
 0x1ad   :  { %1276 = vtanh.f32 %v1658_v46 }
 0x1ba   :  { %v1277_v47 = vpop.eup %1276 }
 0x1bb   :  { %v424_v48 = vmul.f32 %v1277_v47, %v1275_v43 }
 0x1bd   :  { %v425_v51 = vpack.c.bf16 %v424_v48, %v424_v48 }
 0x1bf   :  { %467 = vmatmul.mubr.bf16.vlgmr.msra.gmra.mxu0 %v425_v51  ;;  %508 = vmatmul.mubr.bf16.vlgmr.msra.gmra.mxu1 %v425_v51 }
 0x1c0   :  { %550 = vmatpush1.bf16.msra.mxu0 %v1501_v11  ;;  %591 = vmatpush1.bf16.msra.mxu1 %v1503_v12 }
 0x1c1   :  { %551 = vmatprep.subr.bf16.mxu0 %v1506_v13  ;;  %592 = vmatprep.subr.bf16.mxu1 %v1510_v14 }
 0x1c2   :  { %581 = vmatprep.mubr.bf16.mxu0 %v1431_v1  ;;  %622 = vmatprep.mubr.bf16.mxu1 %v1431_v1 }
 0x1c4   :  { %552 = vmatpush1.bf16.msra.mxu0 %v1512_v15  ;;  %593 = vmatpush1.bf16.msra.mxu1 %v1515_v16 }
 0x1c5   :  { %553 = vmatprep.subr.bf16.mxu0 %v1518_v17  ;;  %594 = vmatprep.subr.bf16.mxu1 %v1520_v18 }
 0x1c8   :  { %554 = vmatpush1.bf16.msra.mxu0 %v1522_v19  ;;  %595 = vmatpush1.bf16.msra.mxu1 %v1524_v20 }
 0x1c9   :  { %555 = vmatprep.subr.bf16.mxu0 %v1528_v21  ;;  %596 = vmatprep.subr.bf16.mxu1 %v1532_v22 }
 0x1cc   :  { %556 = vmatpush1.bf16.msra.mxu0 %v1534_v23  ;;  %597 = vmatpush1.bf16.msra.mxu1 %v1538_v24 }
 0x1cd   :  { %557 = vmatprep.subr.bf16.mxu0 %v1540_v25  ;;  %598 = vmatprep.subr.bf16.mxu1 %v1544_v26 }
 0x1d0   :  { %558 = vmatpush1.bf16.msra.mxu0 %v1546_v27  ;;  %599 = vmatpush1.bf16.msra.mxu1 %v1548_v28 }
 0x1d1   :  { %559 = vmatprep.subr.bf16.mxu0 %v1552_v29  ;;  %600 = vmatprep.subr.bf16.mxu1 %v1556_v30 }
 0x1d4   :  { %560 = vmatpush1.bf16.msra.mxu0 %v1560_v31  ;;  %601 = vmatpush1.bf16.msra.mxu1 %v1562_v32 }
 0x1d5   :  { %561 = vmatprep.subr.bf16.mxu0 %v1566_v33  ;;  %602 = vmatprep.subr.bf16.mxu1 %v1568_v34 }
 0x1d8   :  { %562 = vmatpush1.bf16.msra.mxu0 %v1572_v35  ;;  %603 = vmatpush1.bf16.msra.mxu1 %v1574_v36 }
 0x1d9   :  { %563 = vmatprep.subr.bf16.mxu0 %v1578_v37  ;;  %604 = vmatprep.subr.bf16.mxu1 %v1580_v38 }
 0x1dc   :  { %564 = vmatpush1.bf16.msra.mxu0 %v1584_v39  ;;  %605 = vmatpush1.bf16.msra.mxu1 %v1586_v40 }
 0x1dd   :  { %664 = vmatprep.subr.bf16.mxu0 %v1493_v8  ;;  %705 = vmatprep.subr.bf16.mxu1 %v1498_v10 }
 0x27f   :  { %v468_v52 = vpop.f32.mrf.mxu0  ;;  %v509_v53 = vpop.f32.mrf.mxu1 }
 0x280   :  { %v469_v54 = vadd.f32 %v468_v52, %v426_v4  ;;  %v510_v9 = vadd.f32 %v509_v53, %v428_v7 }
 0x281   :  { %v470_v57 = vpop.f32.mrf.mxu0  ;;  %v511_v58 = vpop.f32.mrf.mxu1 }
 0x282   :  { %v1178_v59 = vmul.f32 -1.442695, %v469_v54  ;;  %v471_v61 = vadd.f32 %v470_v57, %v427_v55  ;;  %v512_v6 = vadd.f32 %v511_v58, %v429_v5 }
 0x283   :  { %v472_v62 = vpop.f32.mrf.mxu0  ;;  %v513_v63 = vpop.f32.mrf.mxu1 }
 0x284   :  { %1278 = vpow2.f32 %v1178_v59  ;;  %v1179_v0 = vmul.f32 -1.442695, %v471_v61  ;;  %v1180_v41 = vmul.f32 -1.442695, %v512_v6 }
 0x285   :  { %v473_v2 = vpop.f32.mrf.mxu0  ;;  %v514_v3 = vpop.f32.mrf.mxu1 }
 0x286   :  { %1280 = vpow2.f32 %v1179_v0  ;;  %v542_v2 = vrot.slane %v1603_v50, 3 }
 0x287   :  { %1282 = vtanh.f32 %v510_v9 }
 0x288   :  { %1284 = vpow2.f32 %v1180_v41 }
 0x291   :  { %v1279_v42 = vpop.eup %1278 }
 0x292   :  { %v519_v44 = vadd.f32 1.0, %v1279_v42 }
 0x293   :  { %v1281_v45 = vpop.eup %1280 }
 0x294   :  { %1286 = vrcp.f32 %v519_v44  ;;  %v525_v43 = vadd.f32 1.0, %v1281_v45  ;;  %v1283_v47 = vpop.eup %1282 }
 0x295   :  { %v1285_v48 = vpop.eup %1284 }
 0x296   :  { %1288 = vrcp.f32 %v525_v43  ;;  %v532_v54 = vadd.f32 1.0, %v1285_v48  ;;  %v544_v43 = vrot.slane %v1609_v56, 3  ;;  %v543_v48 = vrot.slane %v1613_v60, 3 }
 0x298   :  { %1290 = vrcp.f32 %v532_v54 }
 0x2a1   :  { %v1287_v51 = vpop.eup %1286 }
 0x2a2   :  { %v536_v4 = vmul.f32 %v1287_v51, %v1283_v47 }
 0x2a3   :  { %v1289_v52 = vpop.eup %1288 }
 0x2a4   :  { %v535_v55 = vmul.f32 %v1289_v52, %v1658_v46  ;;  %v541_v46 = vrot.slane %v1600_v49, 3 }
 0x2a5   :  { %v1291_v53 = vpop.eup %1290 }
 0x2a6   :  { %v1700_v57 = vadd.f32 %v536_v4, %v535_v55 }
 0x2a8   :  { %1292 = vtanh.f32 %v1700_v57 }
 0x2b5   :  { %v1293_v58 = vpop.eup %1292 }
 0x2b6   :  { %v539_v59 = vmul.f32 %v1293_v58, %v1291_v53 }
 0x2b8   :  { %v540_v61 = vpack.c.bf16 %v539_v59, %v539_v59 }
 0x2ba   :  { %582 = vmatmul.mubr.bf16.vlgmr.msra.gmra.mxu0 %v540_v61  ;;  %623 = vmatmul.mubr.bf16.vlgmr.msra.gmra.mxu1 %v540_v61 }
 0x2bb   :  { %665 = vmatpush1.bf16.msra.mxu0 %v1501_v11  ;;  %706 = vmatpush1.bf16.msra.mxu1 %v1503_v12 }
 0x2bc   :  { %666 = vmatprep.subr.bf16.mxu0 %v1506_v13  ;;  %707 = vmatprep.subr.bf16.mxu1 %v1510_v14 }
 0x2bd   :  { %696 = vmatprep.mubr.bf16.mxu0 %v1431_v1  ;;  %737 = vmatprep.mubr.bf16.mxu1 %v1431_v1 }
 0x2bf   :  { %667 = vmatpush1.bf16.msra.mxu0 %v1512_v15  ;;  %708 = vmatpush1.bf16.msra.mxu1 %v1515_v16 }
 0x2c0   :  { %668 = vmatprep.subr.bf16.mxu0 %v1518_v17  ;;  %709 = vmatprep.subr.bf16.mxu1 %v1520_v18 }
 0x2c3   :  { %669 = vmatpush1.bf16.msra.mxu0 %v1522_v19  ;;  %710 = vmatpush1.bf16.msra.mxu1 %v1524_v20 }
 0x2c4   :  { %670 = vmatprep.subr.bf16.mxu0 %v1528_v21  ;;  %711 = vmatprep.subr.bf16.mxu1 %v1532_v22 }
 0x2c7   :  { %671 = vmatpush1.bf16.msra.mxu0 %v1534_v23  ;;  %712 = vmatpush1.bf16.msra.mxu1 %v1538_v24 }
 0x2c8   :  { %672 = vmatprep.subr.bf16.mxu0 %v1540_v25  ;;  %713 = vmatprep.subr.bf16.mxu1 %v1544_v26 }
 0x2cb   :  { %673 = vmatpush1.bf16.msra.mxu0 %v1546_v27  ;;  %714 = vmatpush1.bf16.msra.mxu1 %v1548_v28 }
 0x2cc   :  { %674 = vmatprep.subr.bf16.mxu0 %v1552_v29  ;;  %715 = vmatprep.subr.bf16.mxu1 %v1556_v30 }
 0x2cf   :  { %675 = vmatpush1.bf16.msra.mxu0 %v1560_v31  ;;  %716 = vmatpush1.bf16.msra.mxu1 %v1562_v32 }
 0x2d0   :  { %676 = vmatprep.subr.bf16.mxu0 %v1566_v33  ;;  %717 = vmatprep.subr.bf16.mxu1 %v1568_v34 }
 0x2d3   :  { %677 = vmatpush1.bf16.msra.mxu0 %v1572_v35  ;;  %718 = vmatpush1.bf16.msra.mxu1 %v1574_v36 }
 0x2d4   :  { %678 = vmatprep.subr.bf16.mxu0 %v1578_v37  ;;  %719 = vmatprep.subr.bf16.mxu1 %v1580_v38 }
 0x2d7   :  { %679 = vmatpush1.bf16.msra.mxu0 %v1584_v39  ;;  %720 = vmatpush1.bf16.msra.mxu1 %v1586_v40 }
 0x2d8   :  { %779 = vmatprep.subr.bf16.mxu0 %v1493_v8  ;;  %820 = vmatprep.subr.bf16.mxu1 %v1498_v10 }
 0x37a   :  { %v583_v62 = vpop.f32.mrf.mxu0  ;;  %v624_v63 = vpop.f32.mrf.mxu1 }
 0x37b   :  { %v584_v0 = vadd.f32 %v583_v62, %v541_v46  ;;  %v625_v51 = vadd.f32 %v624_v63, %v543_v48 }
 0x37c   :  { %v585_v3 = vpop.f32.mrf.mxu0  ;;  %v626_v5 = vpop.f32.mrf.mxu1 }
 0x37d   :  { %v1181_v6 = vmul.f32 -1.442695, %v584_v0  ;;  %v586_v7 = vadd.f32 %v585_v3, %v542_v2  ;;  %v627_v47 = vadd.f32 %v626_v5, %v544_v43 }
 0x37e   :  { %v587_v9 = vpop.f32.mrf.mxu0  ;;  %v628_v41 = vpop.f32.mrf.mxu1 }
 0x37f   :  { %1294 = vpow2.f32 %v1181_v6  ;;  %v1182_v42 = vmul.f32 -1.442695, %v586_v7  ;;  %v1183_v4 = vmul.f32 -1.442695, %v627_v47 }
 0x380   :  { %v588_v44 = vpop.f32.mrf.mxu0  ;;  %v629_v45 = vpop.f32.mrf.mxu1 }
 0x381   :  { %1296 = vpow2.f32 %v1182_v42  ;;  %v657_v44 = vrot.slane %v1603_v50, 4 }
 0x382   :  { %1298 = vtanh.f32 %v625_v51 }
 0x383   :  { %1300 = vpow2.f32 %v1183_v4 }
 0x38c   :  { %v1295_v52 = vpop.eup %1294 }
 0x38d   :  { %v634_v54 = vadd.f32 1.0, %v1295_v52 }
 0x38e   :  { %v1297_v55 = vpop.eup %1296 }
 0x38f   :  { %1302 = vrcp.f32 %v634_v54  ;;  %v640_v53 = vadd.f32 1.0, %v1297_v55  ;;  %v1299_v58 = vpop.eup %1298 }
 0x390   :  { %v1301_v59 = vpop.eup %1300 }
 0x391   :  { %1304 = vrcp.f32 %v640_v53  ;;  %v647_v0 = vadd.f32 1.0, %v1301_v59  ;;  %v659_v53 = vrot.slane %v1609_v56, 4  ;;  %v658_v59 = vrot.slane %v1613_v60, 4 }
 0x393   :  { %1306 = vrcp.f32 %v647_v0 }
 0x39c   :  { %v1303_v61 = vpop.eup %1302 }
 0x39d   :  { %v651_v46 = vmul.f32 %v1303_v61, %v1299_v58 }
 0x39e   :  { %v1305_v62 = vpop.eup %1304 }
 0x39f   :  { %v650_v2 = vmul.f32 %v1305_v62, %v1700_v57  ;;  %v656_v57 = vrot.slane %v1600_v49, 4 }
 0x3a0   :  { %v1307_v63 = vpop.eup %1306 }
 0x3a1   :  { %v1742_v3 = vadd.f32 %v651_v46, %v650_v2 }
 0x3a3   :  { %1308 = vtanh.f32 %v1742_v3 }
 0x3b0   :  { %v1309_v5 = vpop.eup %1308 }
 0x3b1   :  { %v654_v6 = vmul.f32 %v1309_v5, %v1307_v63 }
 0x3b3   :  { %v655_v7 = vpack.c.bf16 %v654_v6, %v654_v6 }
 0x3b5   :  { %697 = vmatmul.mubr.bf16.vlgmr.msra.gmra.mxu0 %v655_v7  ;;  %738 = vmatmul.mubr.bf16.vlgmr.msra.gmra.mxu1 %v655_v7 }
 0x3b6   :  { %780 = vmatpush1.bf16.msra.mxu0 %v1501_v11  ;;  %821 = vmatpush1.bf16.msra.mxu1 %v1503_v12 }
 0x3b7   :  { %781 = vmatprep.subr.bf16.mxu0 %v1506_v13  ;;  %822 = vmatprep.subr.bf16.mxu1 %v1510_v14 }
 0x3b8   :  { %811 = vmatprep.mubr.bf16.mxu0 %v1431_v1  ;;  %852 = vmatprep.mubr.bf16.mxu1 %v1431_v1 }
 0x3ba   :  { %782 = vmatpush1.bf16.msra.mxu0 %v1512_v15  ;;  %823 = vmatpush1.bf16.msra.mxu1 %v1515_v16 }
 0x3bb   :  { %783 = vmatprep.subr.bf16.mxu0 %v1518_v17  ;;  %824 = vmatprep.subr.bf16.mxu1 %v1520_v18 }
 0x3be   :  { %784 = vmatpush1.bf16.msra.mxu0 %v1522_v19  ;;  %825 = vmatpush1.bf16.msra.mxu1 %v1524_v20 }
 0x3bf   :  { %785 = vmatprep.subr.bf16.mxu0 %v1528_v21  ;;  %826 = vmatprep.subr.bf16.mxu1 %v1532_v22 }
 0x3c2   :  { %786 = vmatpush1.bf16.msra.mxu0 %v1534_v23  ;;  %827 = vmatpush1.bf16.msra.mxu1 %v1538_v24 }
 0x3c3   :  { %787 = vmatprep.subr.bf16.mxu0 %v1540_v25  ;;  %828 = vmatprep.subr.bf16.mxu1 %v1544_v26 }
 0x3c6   :  { %788 = vmatpush1.bf16.msra.mxu0 %v1546_v27  ;;  %829 = vmatpush1.bf16.msra.mxu1 %v1548_v28 }
 0x3c7   :  { %789 = vmatprep.subr.bf16.mxu0 %v1552_v29  ;;  %830 = vmatprep.subr.bf16.mxu1 %v1556_v30 }
 0x3ca   :  { %790 = vmatpush1.bf16.msra.mxu0 %v1560_v31  ;;  %831 = vmatpush1.bf16.msra.mxu1 %v1562_v32 }
 0x3cb   :  { %791 = vmatprep.subr.bf16.mxu0 %v1566_v33  ;;  %832 = vmatprep.subr.bf16.mxu1 %v1568_v34 }
 0x3ce   :  { %792 = vmatpush1.bf16.msra.mxu0 %v1572_v35  ;;  %833 = vmatpush1.bf16.msra.mxu1 %v1574_v36 }
 0x3cf   :  { %793 = vmatprep.subr.bf16.mxu0 %v1578_v37  ;;  %834 = vmatprep.subr.bf16.mxu1 %v1580_v38 }
 0x3d2   :  { %794 = vmatpush1.bf16.msra.mxu0 %v1584_v39  ;;  %835 = vmatpush1.bf16.msra.mxu1 %v1586_v40 }
 0x3d3   :  { %894 = vmatprep.subr.bf16.mxu0 %v1493_v8  ;;  %935 = vmatprep.subr.bf16.mxu1 %v1498_v10 }
 0x475   :  { %v698_v9 = vpop.f32.mrf.mxu0  ;;  %v739_v41 = vpop.f32.mrf.mxu1 }
 0x476   :  { %v699_v42 = vadd.f32 %v698_v9, %v656_v57  ;;  %v740_v61 = vadd.f32 %v739_v41, %v658_v59 }
 0x477   :  { %v700_v45 = vpop.f32.mrf.mxu0  ;;  %v741_v43 = vpop.f32.mrf.mxu1 }
 0x478   :  { %v1184_v47 = vmul.f32 -1.442695, %v699_v42  ;;  %v701_v48 = vadd.f32 %v700_v45, %v657_v44  ;;  %v742_v58 = vadd.f32 %v741_v43, %v659_v53 }
 0x479   :  { %v702_v51 = vpop.f32.mrf.mxu0  ;;  %v743_v4 = vpop.f32.mrf.mxu1 }
 0x47a   :  { %1310 = vpow2.f32 %v1184_v47  ;;  %v1185_v52 = vmul.f32 -1.442695, %v701_v48  ;;  %v1186_v46 = vmul.f32 -1.442695, %v742_v58 }
 0x47b   :  { %v703_v54 = vpop.f32.mrf.mxu0  ;;  %v744_v55 = vpop.f32.mrf.mxu1 }
 0x47c   :  { %1312 = vpow2.f32 %v1185_v52  ;;  %v773_v54 = vrot.slane %v1613_v60, 5 }
 0x47d   :  { %1314 = vtanh.f32 %v740_v61 }
 0x47e   :  { %1316 = vpow2.f32 %v1186_v46 }
 0x487   :  { %v1311_v62 = vpop.eup %1310 }
 0x488   :  { %v749_v0 = vadd.f32 1.0, %v1311_v62 }
 0x489   :  { %v1313_v2 = vpop.eup %1312 }
 0x48a   :  { %1318 = vrcp.f32 %v749_v0  ;;  %v755_v63 = vadd.f32 1.0, %v1313_v2  ;;  %v1315_v5 = vpop.eup %1314 }
 0x48b   :  { %v1317_v6 = vpop.eup %1316 }
 0x48c   :  { %1320 = vrcp.f32 %v755_v63  ;;  %v762_v42 = vadd.f32 1.0, %v1317_v6 }
 0x48e   :  { %1322 = vrcp.f32 %v762_v42 }
 0x497   :  { %v1319_v7 = vpop.eup %1318 }
 0x498   :  { %v766_v57 = vmul.f32 %v1319_v7, %v1315_v5 }
 0x499   :  { %v1321_v9 = vpop.eup %1320 }
 0x49a   :  { %v765_v44 = vmul.f32 %v1321_v9, %v1742_v3 }
 0x49b   :  { %v1323_v41 = vpop.eup %1322 }
 0x49c   :  { %v1784_v45 = vadd.f32 %v766_v57, %v765_v44 }
 0x49e   :  { %1324 = vtanh.f32 %v1784_v45 }
 0x4ab   :  { %v1325_v43 = vpop.eup %1324 }
 0x4ac   :  { %v769_v47 = vmul.f32 %v1325_v43, %v1323_v41  ;;  %v1374_v43 = vld [vmem:[#allocation3 + $0xe0] ss:$16 sps:$4 sm:$0xff]  }
 0x4ae   :  { %v770_v48 = vpack.c.bf16 %v769_v47, %v769_v47  ;;  %v1375_v47 = vld [vmem:[#allocation3 + $0xe8] ss:$16 sps:$4 sm:$0xff]  }
 0x4b0   :  { %812 = vmatmul.mubr.bf16.vlgmr.msra.gmra.mxu0 %v770_v48  ;;  %853 = vmatmul.mubr.bf16.vlgmr.msra.gmra.mxu1 %v770_v48  ;;  %v1376_v48 = vld [vmem:[#allocation3 + $0xc4] ss:$16 sps:$4 sm:$0xff]  }
 0x4b1   :  { %895 = vmatpush1.bf16.msra.mxu0 %v1501_v11  ;;  %936 = vmatpush1.bf16.msra.mxu1 %v1503_v12  ;;  %v771_v11 = vrot.slane %v1600_v49, 5 }
 0x4b2   :  { %896 = vmatprep.subr.bf16.mxu0 %v1506_v13  ;;  %937 = vmatprep.subr.bf16.mxu1 %v1510_v14 }
 0x4b3   :  { %926 = vmatprep.mubr.bf16.mxu0 %v1431_v1  ;;  %967 = vmatprep.mubr.bf16.mxu1 %v1431_v1 }
 0x4b5   :  { %897 = vmatpush1.bf16.msra.mxu0 %v1512_v15  ;;  %938 = vmatpush1.bf16.msra.mxu1 %v1515_v16  ;;  %v772_v15 = vrot.slane %v1603_v50, 5 }
 0x4b6   :  { %898 = vmatprep.subr.bf16.mxu0 %v1518_v17  ;;  %939 = vmatprep.subr.bf16.mxu1 %v1520_v18 }
 0x4b9   :  { %899 = vmatpush1.bf16.msra.mxu0 %v1522_v19  ;;  %940 = vmatpush1.bf16.msra.mxu1 %v1524_v20 }
 0x4ba   :  { %900 = vmatprep.subr.bf16.mxu0 %v1528_v21  ;;  %941 = vmatprep.subr.bf16.mxu1 %v1532_v22 }
 0x4bd   :  { %901 = vmatpush1.bf16.msra.mxu0 %v1534_v23  ;;  %942 = vmatpush1.bf16.msra.mxu1 %v1538_v24 }
 0x4be   :  { %902 = vmatprep.subr.bf16.mxu0 %v1540_v25  ;;  %943 = vmatprep.subr.bf16.mxu1 %v1544_v26 }
 0x4c1   :  { %903 = vmatpush1.bf16.msra.mxu0 %v1546_v27  ;;  %944 = vmatpush1.bf16.msra.mxu1 %v1548_v28 }
 0x4c2   :  { %904 = vmatprep.subr.bf16.mxu0 %v1552_v29  ;;  %945 = vmatprep.subr.bf16.mxu1 %v1556_v30 }
 0x4c5   :  { %905 = vmatpush1.bf16.msra.mxu0 %v1560_v31  ;;  %946 = vmatpush1.bf16.msra.mxu1 %v1562_v32 }
 0x4c6   :  { %906 = vmatprep.subr.bf16.mxu0 %v1566_v33  ;;  %947 = vmatprep.subr.bf16.mxu1 %v1568_v34 }
 0x4c9   :  { %907 = vmatpush1.bf16.msra.mxu0 %v1572_v35  ;;  %948 = vmatpush1.bf16.msra.mxu1 %v1574_v36 }
 0x4ca   :  { %908 = vmatprep.subr.bf16.mxu0 %v1578_v37  ;;  %949 = vmatprep.subr.bf16.mxu1 %v1580_v38 }
 0x4cd   :  { %909 = vmatpush1.bf16.msra.mxu0 %v1584_v39  ;;  %950 = vmatpush1.bf16.msra.mxu1 %v1586_v40 }
 0x4ce   :  { %1009 = vmatprep.subr.bf16.mxu0 %v1493_v8  ;;  %1050 = vmatprep.subr.bf16.mxu1 %v1498_v10  ;;  %v774_v8 = vrot.slane %v1609_v56, 5 }
 0x570   :  { %v813_v12 = vpop.f32.mrf.mxu0  ;;  %v854_v13 = vpop.f32.mrf.mxu1 }
 0x571   :  { %v814_v14 = vadd.f32 %v813_v12, %v771_v11  ;;  %v855_v55 = vadd.f32 %v854_v13, %v773_v54  ;;  %v1377_v11 = vld [vmem:[#allocation3 + $0xcc] ss:$16 sps:$4 sm:$0xff]   ;;  %v1379_v12 = vld [vmem:[#allocation3 + $0xc8] ss:$16 sps:$4 sm:$0xff]   ;;  %v1380_v13 = vld [vmem:[#allocation3 + $0xa4] ss:$16 sps:$4 sm:$0xff]  }
 0x572   :  { %v815_v16 = vpop.f32.mrf.mxu0  ;;  %v856_v17 = vpop.f32.mrf.mxu1 }
 0x573   :  { %v1187_v18 = vmul.f32 -1.442695, %v814_v14  ;;  %v816_v19 = vadd.f32 %v815_v16, %v772_v15  ;;  %v857_v10 = vadd.f32 %v856_v17, %v774_v8  ;;  %v1381_v14 = vld [vmem:[#allocation3 + $0xac] ss:$16 sps:$4 sm:$0xff]   ;;  %v1382_v15 = vld [vmem:[#allocation3 + $0xa0] ss:$16 sps:$4 sm:$0xff]  }
 0x574   :  { %v817_v20 = vpop.f32.mrf.mxu0  ;;  %v858_v3 = vpop.f32.mrf.mxu1  ;;  %v1383_v16 = vld [vmem:[#allocation3 + $0xa8] ss:$16 sps:$4 sm:$0xff]  }
 0x575   :  { %1326 = vpow2.f32 %v1187_v18  ;;  %v1188_v51 = vmul.f32 -1.442695, %v816_v19  ;;  %v1189_v53 = vmul.f32 -1.442695, %v857_v10 }
 0x576   :  { %v818_v4 = vpop.f32.mrf.mxu0  ;;  %v859_v52 = vpop.f32.mrf.mxu1 }
 0x577   :  { %1328 = vpow2.f32 %v1188_v51 }
 0x578   :  { %1330 = vtanh.f32 %v855_v55 }
 0x579   :  { %1332 = vpow2.f32 %v1189_v53 }
 0x582   :  { %v1327_v58 = vpop.eup %1326 }
 0x583   :  { %v864_v59 = vadd.f32 1.0, %v1327_v58 }
 0x584   :  { %v1329_v61 = vpop.eup %1328 }
 0x585   :  { %1334 = vrcp.f32 %v864_v59  ;;  %v870_v46 = vadd.f32 1.0, %v1329_v61  ;;  %v1331_v62 = vpop.eup %1330  ;;  %v1001_v59 = vrot.slane %v1600_v49, 7 }
 0x586   :  { %v1333_v0 = vpop.eup %1332 }
 0x587   :  { %1336 = vrcp.f32 %v870_v46  ;;  %v877_v6 = vadd.f32 1.0, %v1333_v0  ;;  %v1002_v0 = vrot.slane %v1603_v50, 7 }
 0x589   :  { %1338 = vrcp.f32 %v877_v6 }
 0x592   :  { %v1335_v2 = vpop.eup %1334 }
 0x593   :  { %v881_v63 = vmul.f32 %v1335_v2, %v1331_v62 }
 0x594   :  { %v1337_v5 = vpop.eup %1336 }
 0x595   :  { %v880_v7 = vmul.f32 %v1337_v5, %v1784_v45  ;;  %v1378_v45 = vld [vmem:[#allocation3 + $0xc0] ss:$16 sps:$4 sm:$0xff]  }
 0x596   :  { %v1339_v9 = vpop.eup %1338 }
 0x597   :  { %v1826_v57 = vadd.f32 %v881_v63, %v880_v7 }
 0x599   :  { %1340 = vtanh.f32 %v1826_v57 }
 0x5a6   :  { %v1341_v42 = vpop.eup %1340 }
 0x5a7   :  { %v884_v44 = vmul.f32 %v1341_v42, %v1339_v9 }
 0x5a9   :  { %v885_v41 = vpack.c.bf16 %v884_v44, %v884_v44 }
 0x5ab   :  { %927 = vmatmul.mubr.bf16.vlgmr.msra.gmra.mxu0 %v885_v41  ;;  %968 = vmatmul.mubr.bf16.vlgmr.msra.gmra.mxu1 %v885_v41  ;;  %v1004_v41 = vrot.slane %v1609_v56, 7 }
 0x5ac   :  { %1010 = vmatpush1.bf16.msra.mxu0 %v1374_v43  ;;  %1051 = vmatpush1.bf16.msra.mxu1 %v1375_v47 }
 0x5ad   :  { %1011 = vmatprep.subr.bf16.mxu0 %v1376_v48  ;;  %1052 = vmatprep.subr.bf16.mxu1 %v1377_v11 }
 0x5ae   :  { %1041 = vmatprep.mubr.bf16.mxu0 %v1431_v1  ;;  %1082 = vmatprep.mubr.bf16.mxu1 %v1431_v1  ;;  %v886_v1 = vrot.slane %v1600_v49, 6  ;;  %v1003_v49 = vrot.slane %v1613_v60, 7 }
 0x5b0   :  { %1012 = vmatpush1.bf16.msra.mxu0 %v1378_v45  ;;  %1053 = vmatpush1.bf16.msra.mxu1 %v1379_v12 }
 0x5b1   :  { %1013 = vmatprep.subr.bf16.mxu0 %v1380_v13  ;;  %1054 = vmatprep.subr.bf16.mxu1 %v1381_v14 }
 0x5b4   :  { %1014 = vmatpush1.bf16.msra.mxu0 %v1382_v15  ;;  %1055 = vmatpush1.bf16.msra.mxu1 %v1383_v16 }
 0x5b5   :  { %1015 = vmatprep.subr.bf16.mxu0 %v1528_v21  ;;  %1056 = vmatprep.subr.bf16.mxu1 %v1532_v22 }
 0x5b8   :  { %1016 = vmatpush1.bf16.msra.mxu0 %v1534_v23  ;;  %1057 = vmatpush1.bf16.msra.mxu1 %v1538_v24  ;;  %v887_v24 = vrot.slane %v1603_v50, 6 }
 0x5b9   :  { %1017 = vmatprep.subr.bf16.mxu0 %v1540_v25  ;;  %1058 = vmatprep.subr.bf16.mxu1 %v1544_v26 }
 0x5bc   :  { %1018 = vmatpush1.bf16.msra.mxu0 %v1546_v27  ;;  %1059 = vmatpush1.bf16.msra.mxu1 %v1548_v28 }
 0x5bd   :  { %1019 = vmatprep.subr.bf16.mxu0 %v1552_v29  ;;  %1060 = vmatprep.subr.bf16.mxu1 %v1556_v30 }
 0x5c0   :  { %1020 = vmatpush1.bf16.msra.mxu0 %v1560_v31  ;;  %1061 = vmatpush1.bf16.msra.mxu1 %v1562_v32 }
 0x5c1   :  { %1021 = vmatprep.subr.bf16.mxu0 %v1566_v33  ;;  %1062 = vmatprep.subr.bf16.mxu1 %v1568_v34  ;;  %v889_v34 = vrot.slane %v1609_v56, 6 }
 0x5c4   :  { %1022 = vmatpush1.bf16.msra.mxu0 %v1572_v35  ;;  %1063 = vmatpush1.bf16.msra.mxu1 %v1574_v36  ;;  %v888_v36 = vrot.slane %v1613_v60, 6 }
 0x5c5   :  { %1023 = vmatprep.subr.bf16.mxu0 %v1578_v37  ;;  %1064 = vmatprep.subr.bf16.mxu1 %v1580_v38 }
 0x5c8   :  { %1024 = vmatpush1.bf16.msra.mxu0 %v1584_v39  ;;  %1065 = vmatpush1.bf16.msra.mxu1 %v1586_v40 }
 0x66b   :  { %v928_v21 = vpop.f32.mrf.mxu0  ;;  %v969_v22 = vpop.f32.mrf.mxu1 }
 0x66c   :  { %v929_v23 = vadd.f32 %v928_v21, %v886_v1  ;;  %v970_v37 = vadd.f32 %v969_v22, %v888_v36 }
 0x66d   :  { %v930_v25 = vpop.f32.mrf.mxu0  ;;  %v971_v26 = vpop.f32.mrf.mxu1 }
 0x66e   :  { %v1190_v27 = vmul.f32 -1.442695, %v929_v23  ;;  %v931_v28 = vadd.f32 %v930_v25, %v887_v24  ;;  %v972_v35 = vadd.f32 %v971_v26, %v889_v34  ;;  %v1115_v24 = vld [vmem:[%s1873_s4] sm:$0x1] }
 0x66f   :  { %v932_v29 = vpop.f32.mrf.mxu0  ;;  %v973_v30 = vpop.f32.mrf.mxu1 }
 0x670   :  { %1342 = vpow2.f32 %v1190_v27  ;;  %v1191_v31 = vmul.f32 -1.442695, %v931_v28  ;;  %v1192_v38 = vmul.f32 -1.442695, %v972_v35  ;;  %v1122_v28 = vstv %s1874_s5 }
 0x671   :  { %v933_v32 = vpop.f32.mrf.mxu0  ;;  %v974_v33 = vpop.f32.mrf.mxu1 }
 0x672   :  { %1344 = vpow2.f32 %v1191_v31 }
 0x673   :  { %1346 = vtanh.f32 %v970_v37 }
 0x674   :  { %1348 = vpow2.f32 %v1192_v38 }
 0x67d   :  { %v1343_v39 = vpop.eup %1342 }
 0x67e   :  { %v979_v40 = vadd.f32 1.0, %v1343_v39 }
 0x67f   :  { %v1345_v17 = vpop.eup %1344 }
 0x680   :  { %1350 = vrcp.f32 %v979_v40  ;;  %v985_v18 = vadd.f32 1.0, %v1345_v17  ;;  %v1347_v19 = vpop.eup %1346 }
 0x681   :  { %v1349_v20 = vpop.eup %1348 }
 0x682   :  { %1352 = vrcp.f32 %v985_v18  ;;  %v992_v52 = vadd.f32 1.0, %v1349_v20 }
 0x684   :  { %1354 = vrcp.f32 %v992_v52 }
 0x68d   :  { %v1351_v3 = vpop.eup %1350 }
 0x68e   :  { %v996_v51 = vmul.f32 %v1351_v3, %v1347_v19 }
 0x68f   :  { %v1353_v4 = vpop.eup %1352 }
 0x690   :  { %v995_v8 = vmul.f32 %v1353_v4, %v1826_v57 }
 0x691   :  { %v1355_v54 = vpop.eup %1354 }
 0x692   :  { %v997_v10 = vadd.f32 %v996_v51, %v995_v8 }
 0x694   :  { %1356 = vtanh.f32 %v997_v10 }
 0x6a1   :  { %v1357_v55 = vpop.eup %1356 }
 0x6a2   :  { %v999_v53 = vmul.f32 %v1357_v55, %v1355_v54 }
 0x6a4   :  { %v1000_v58 = vpack.c.bf16 %v999_v53, %v999_v53 }
 0x6a6   :  { %1042 = vmatmul.mubr.bf16.vlgmr.msra.gmra.mxu0 %v1000_v58  ;;  %1083 = vmatmul.mubr.bf16.vlgmr.msra.gmra.mxu1 %v1000_v58 }
 0x766   :  { %v1043_v61 = vpop.f32.mrf.mxu0  ;;  %v1084_v46 = vpop.f32.mrf.mxu1 }
 0x767   :  { %v1044_v62 = vadd.f32 %v1043_v61, %v1001_v59  ;;  %v1085_v47 = vadd.f32 %v1084_v46, %v1003_v49 }
 0x768   :  { %v1045_v2 = vpop.f32.mrf.mxu0  ;;  %v1086_v63 = vpop.f32.mrf.mxu1 }
 0x769   :  { %v1193_v5 = vmul.f32 -1.442695, %v1044_v62  ;;  %v1046_v6 = vadd.f32 %v1045_v2, %v1002_v0  ;;  %v1087_v43 = vadd.f32 %v1086_v63, %v1004_v41 }
 0x76a   :  { %v1047_v7 = vpop.f32.mrf.mxu0  ;;  %v1088_v57 = vpop.f32.mrf.mxu1 }
 0x76b   :  { %1358 = vpow2.f32 %v1193_v5  ;;  %v1194_v9 = vmul.f32 -1.442695, %v1046_v6  ;;  %v1195_v48 = vmul.f32 -1.442695, %v1087_v43 }
 0x76c   :  { %v1048_v42 = vpop.f32.mrf.mxu0  ;;  %v1089_v44 = vpop.f32.mrf.mxu1 }
 0x76d   :  { %1360 = vpow2.f32 %v1194_v9 }
 0x76e   :  { %1362 = vtanh.f32 %v1085_v47 }
 0x76f   :  { %1364 = vpow2.f32 %v1195_v48 }
 0x778   :  { %v1359_v11 = vpop.eup %1358 }
 0x779   :  { %v1094_v50 = vadd.f32 1.0, %v1359_v11 }
 0x77a   :  { %v1361_v45 = vpop.eup %1360 }
 0x77b   :  { %1366 = vrcp.f32 %v1094_v50  ;;  %v1100_v12 = vadd.f32 1.0, %v1361_v45  ;;  %v1363_v13 = vpop.eup %1362 }
 0x77c   :  { %v1365_v14 = vpop.eup %1364 }
 0x77d   :  { %1368 = vrcp.f32 %v1100_v12  ;;  %v1107_v21 = vadd.f32 1.0, %v1365_v14 }
 0x77f   :  { %1370 = vrcp.f32 %v1107_v21 }
 0x788   :  { %v1367_v15 = vpop.eup %1366 }
 0x789   :  { %v1111_v16 = vmul.f32 %v1367_v15, %v1363_v13 }
 0x78a   :  { %v1369_v1 = vpop.eup %1368 }
 0x78b   :  { %v1110_v56 = vmul.f32 %v1369_v1, %v997_v10 }
 0x78c   :  { %v1371_v60 = vpop.eup %1370 }
 0x78d   :  { %v1112_v22 = vadd.f32 %v1111_v16, %v1110_v56 }
 0x78f   :  { %1372 = vtanh.f32 %v1112_v22 }
 0x79c   :  { %v1373_v23 = vpop.eup %1372 }
 0x79d   :  { %v1114_v25 = vmul.f32 %v1373_v23, %v1371_v60 }
 0x79f   :  { %v1116_v26 = vmul.f32 %v1115_v24, %v1114_v25 }
 0x7a1   :  { %v1118_v27 = vsel %vm1117_vm0, %v1116_v26, 0.0 }
 0x7a2   :  { %1119 = vadd.xlane.f32.xlu0 %v1118_v27 }
 0x82b   :  { %v1120_v29 = vpop.xlane.xlu0 %1119 }
 0x82c   :  { %v1123_v30 = vadd.f32 %v1122_v28, %v1120_v29 }
 0x82e   :  { %1125 = vst.msk [vmem:[#allocation6] sm:$0x1] %vm1124_vm1, %v1123_v30 }
 0x82f   :  { %1415 = shalt.err (!%p1412_p9)
}
 0x830   :  { %1135 = dma.vmem_to_hbm [thread:$0]  %s1133_s11, 16, %s1875_s6, [#allocation5]  }
 0x831   :  { %1426 = dma.done.wait [#allocation5], 16  }
 0x832   :  { %1427 = vsyncadd [#allocation5], 4294967280 }
 0x833   :  { %1139 = vsyncpa [#allocation4], 1 }
 0x834   :  { %1140 = vsyncpa [#allocation5], 1 }

</bundles_post_ra>
